<compile_context>
chip_gen: v5e
topology: v5e:2x2
jax: 0.10.0
libtpu: 0.0.40
codegen_flags: <defaults>
</compile_context>

<pallas_src>
import math

import jax
import jax.numpy as jnp
from jax.experimental import pallas as pl
from jax.experimental.pallas import tpu as pltpu

LN_EPS = 1e-12
VMEM_LIMIT = 32 * 1024 * 1024  # raise v5e's 16 MiB scoped default; matches v6e/v7x default


def _layer_norm(x, gamma, beta, eps=LN_EPS):
    mu = jnp.mean(x, axis=-1, keepdims=True)
    var = jnp.mean((x - mu) ** 2, axis=-1, keepdims=True)
    return (x - mu) * jax.lax.rsqrt(var + eps) * gamma + beta


def _gelu(x):
    # TODO(synk): torch nn.GELU default is the exact erf form; tanh approximation is used
    # for robust Mosaic lowering (difference < 1e-3 relative).
    c = math.sqrt(2.0 / math.pi)
    return 0.5 * x * (1.0 + jnp.tanh(c * (x + 0.044715 * x * x * x)))


# ---------------------------------------------------------------------------
# Kernel 1: token + position + token-type embedding gather, summed, LayerNorm.
# One grid step per token; the embedding rows are gathered by the BlockSpec
# index_maps using the scalar-prefetched ids (no one-hot, no full table in VMEM).
# ---------------------------------------------------------------------------
def _embed_kernel(ids_ref, tts_ref, tok_ref, pos_ref, typ_ref, g_ref, b_ref, out_ref):
    del ids_ref, tts_ref  # only used inside the index_maps
    row = tok_ref[0] + pos_ref[0] + typ_ref[0]          # (1, H) f32
    # TODO(synk): dropout after LayerNorm is identity (eval mode).
    out_ref[0, 0] = _layer_norm(row, g_ref[...], b_ref[...])


def embed_forward(params, input_ids, token_type_ids):
    B, S = input_ids.shape
    V, H = params["tok_emb"].shape
    T = params["typ_emb"].shape[0]
    P = params["pos_emb"].shape[0]
    assert S <= P, "sequence length exceeds max_position_embeddings"

    # Singleton second-minor dim keeps every block's trailing dims equal to the full dims.
    tok3 = params["tok_emb"].reshape(V, 1, H)
    pos3 = params["pos_emb"][:S].reshape(S, 1, H)
    typ3 = params["typ_emb"].reshape(T, 1, H)

    out = pl.pallas_call(
        _embed_kernel,
        out_shape=jax.ShapeDtypeStruct((B, S, 1, H), jnp.float32),
        grid_spec=pltpu.PrefetchScalarGridSpec(
            num_scalar_prefetch=2,
            grid=(B, S),
            in_specs=[
                pl.BlockSpec((1, 1, H), lambda b, s, ids, tts: (ids[b, s], 0, 0)),
                pl.BlockSpec((1, 1, H), lambda b, s, ids, tts: (s, 0, 0)),
                pl.BlockSpec((1, 1, H), lambda b, s, ids, tts: (tts[b, s], 0, 0)),
                pl.BlockSpec((1, H), lambda b, s, ids, tts: (0, 0)),
                pl.BlockSpec((1, H), lambda b, s, ids, tts: (0, 0)),
            ],
            out_specs=pl.BlockSpec((1, 1, 1, H), lambda b, s, ids, tts: (b, s, 0, 0)),
        ),
        compiler_params=pltpu.CompilerParams(
            dimension_semantics=("parallel", "arbitrary"),
            vmem_limit_bytes=VMEM_LIMIT),
    )(input_ids.astype(jnp.int32), token_type_ids.astype(jnp.int32),
      tok3, pos3, typ3, params["ln_g"], params["ln_b"])
    return out.reshape(B, S, H)


# ---------------------------------------------------------------------------
# Kernel 2: fused QKV projection.  grid=(B,), weights stay resident (constant index_map).
# ---------------------------------------------------------------------------
def _qkv_kernel(x_ref, w_ref, b_ref, out_ref):
    x = x_ref[0].astype(jnp.bfloat16)                                    # (S, H)
    acc = jnp.dot(x, w_ref[...], preferred_element_type=jnp.float32) + b_ref[...]
    out_ref[0] = acc.astype(out_ref.dtype)


def qkv_forward(x, wqkv, bqkv):
    B, S, H = x.shape
    O = wqkv.shape[1]
    return pl.pallas_call(
        _qkv_kernel,
        out_shape=jax.ShapeDtypeStruct((B, S, O), jnp.bfloat16),
        grid_spec=pltpu.PrefetchScalarGridSpec(
            num_scalar_prefetch=0,
            grid=(B,),
            in_specs=[
                pl.BlockSpec((1, S, H), lambda b: (b, 0, 0)),
                pl.BlockSpec((H, O), lambda b: (0, 0)),
                pl.BlockSpec((1, O), lambda b: (0, 0)),
            ],
            out_specs=pl.BlockSpec((1, S, O), lambda b: (b, 0, 0)),
        ),
        compiler_params=pltpu.CompilerParams(
            dimension_semantics=("parallel",), vmem_limit_bytes=VMEM_LIMIT),
    )(x, wqkv, bqkv)


# ---------------------------------------------------------------------------
# Kernel 3: attention core.  grid=(B, num_heads), both axes "parallel".
# ---------------------------------------------------------------------------
def _make_attn_kernel(scale):
    def kernel(q_ref, k_ref, v_ref, m_ref, out_ref):
        qh = q_ref[0, 0] * scale                                         # (S, hd) bf16
        s = jax.lax.dot_general(qh, k_ref[0, 0], (((1,), (1,)), ((), ())),
                                preferred_element_type=jnp.float32)      # (S, S) f32
        s = s + m_ref[0]                                                 # additive mask (1, S)
        s = s - jnp.max(s, axis=-1, keepdims=True)
        p = jnp.exp(s)
        p = p * pl.reciprocal(jnp.sum(p, axis=-1, keepdims=True), approx=True)
        z = jnp.dot(p.astype(jnp.bfloat16), v_ref[0, 0],
                    preferred_element_type=jnp.float32)                  # (S, hd)
        out_ref[0, 0] = z.astype(out_ref.dtype)
    return kernel


def attention_forward(q, k, v, add_mask3):
    B, NH, S, HD = q.shape
    kernel = _make_attn_kernel(1.0 / math.sqrt(HD))
    qkv_spec = pl.BlockSpec((1, 1, S, HD), lambda b, h: (b, h, 0, 0))
    return pl.pallas_call(
        kernel,
        out_shape=jax.ShapeDtypeStruct((B, NH, S, HD), jnp.bfloat16),
        grid_spec=pltpu.PrefetchScalarGridSpec(
            num_scalar_prefetch=0,
            grid=(B, NH),
            in_specs=[
                qkv_spec,
                pl.BlockSpec((1, 1, S, HD), lambda b, h: (b, h, 0, 0)),
                pl.BlockSpec((1, 1, S, HD), lambda b, h: (b, h, 0, 0)),
                pl.BlockSpec((1, 1, S), lambda b, h: (b, 0, 0)),
            ],
            out_specs=pl.BlockSpec((1, 1, S, HD), lambda b, h: (b, h, 0, 0)),
        ),
        compiler_params=pltpu.CompilerParams(
            dimension_semantics=("parallel", "parallel"),
            vmem_limit_bytes=VMEM_LIMIT),
    )(q, k, v, add_mask3)


# ---------------------------------------------------------------------------
# Kernel 4: output projection + residual + LN1 + MLP(GELU) + residual + LN2.
# grid=(B,), weights resident.  Single (S,H)@(H,H) projection on concatenated heads.
# ---------------------------------------------------------------------------
def _out_mlp_kernel(a_ref, x_ref, wo_ref, bo_ref, g1_ref, bt1_ref,
                    w1_ref, b1_ref, w2_ref, b2_ref, g2_ref, bt2_ref, out_ref):
    attn = jnp.dot(a_ref[0], wo_ref[...],
                   preferred_element_type=jnp.float32) + bo_ref[...]     # (S, H) f32
    # TODO(synk): dropout layers are identity (eval mode).
    x1 = _layer_norm(x_ref[0] + attn, g1_ref[...], bt1_ref[...])
    h = _gelu(jnp.dot(x1.astype(jnp.bfloat16), w1_ref[...],
                      preferred_element_type=jnp.float32) + b1_ref[...])
    m = jnp.dot(h.astype(jnp.bfloat16), w2_ref[...],
                preferred_element_type=jnp.float32) + b2_ref[...]
    out_ref[0] = _layer_norm(x1 + m, g2_ref[...], bt2_ref[...])


def out_mlp_forward(attn_ctx, x, lp):
    B, S, H = x.shape
    I = lp["w1"].shape[1]
    # TODO(synk): for BERT-base sizes, tile w1/w2 over I (k grid axis + VMEM accumulator)
    # so per-step weights fit v7x's 64 MiB VMEM; full-resident weights are fine at toy sizes.
    return pl.pallas_call(
        _out_mlp_kernel,
        out_shape=jax.ShapeDtypeStruct((B, S, H), jnp.float32),
        grid_spec=pltpu.PrefetchScalarGridSpec(
            num_scalar_prefetch=0,
            grid=(B,),
            in_specs=[
                pl.BlockSpec((1, S, H), lambda b: (b, 0, 0)),
                pl.BlockSpec((1, S, H), lambda b: (b, 0, 0)),
                pl.BlockSpec((H, H), lambda b: (0, 0)),
                pl.BlockSpec((1, H), lambda b: (0, 0)),
                pl.BlockSpec((1, H), lambda b: (0, 0)),
                pl.BlockSpec((1, H), lambda b: (0, 0)),
                pl.BlockSpec((H, I), lambda b: (0, 0)),
                pl.BlockSpec((1, I), lambda b: (0, 0)),
                pl.BlockSpec((I, H), lambda b: (0, 0)),
                pl.BlockSpec((1, H), lambda b: (0, 0)),
                pl.BlockSpec((1, H), lambda b: (0, 0)),
                pl.BlockSpec((1, H), lambda b: (0, 0)),
            ],
            out_specs=pl.BlockSpec((1, S, H), lambda b: (b, 0, 0)),
        ),
        compiler_params=pltpu.CompilerParams(
            dimension_semantics=("parallel",), vmem_limit_bytes=VMEM_LIMIT),
    )(attn_ctx, x, lp["wo"], lp["bo"], lp["ln1_g"], lp["ln1_b"],
      lp["w1"], lp["b1"], lp["w2"], lp["b2"], lp["ln2_g"], lp["ln2_b"])


def block_forward(lp, x, add_mask3):
    B, S, H = x.shape
    nh = lp["num_heads"]
    hd = H // nh
    qkv = qkv_forward(x, lp["wqkv"], lp["bqkv"])                         # (B, S, 3H) bf16
    # Wrapper-side layout plumbing (cheap XLA reshapes/transposes):
    qkv = qkv.reshape(B, S, 3, nh, hd).transpose(2, 0, 3, 1, 4)          # (3, B, nh, S, hd)
    q, k, v = qkv[0], qkv[1], qkv[2]
    ctx = attention_forward(q, k, v, add_mask3)                          # (B, nh, S, hd) bf16
    ctx = ctx.transpose(0, 2, 1, 3).reshape(B, S, H)                     # concat heads
    return out_mlp_forward(ctx, x, lp)


# ---------------------------------------------------------------------------
# Parameter init (deterministic) + full forward
# ---------------------------------------------------------------------------
def init_params(key, config):
    V = config["vocab_size"]; H = config["hidden_size"]
    P = config["max_position_embeddings"]; T = config["type_vocab_size"]
    L = config["num_layers"]; I = config["intermediate_size"]
    nh = config["num_heads"]

    def nrm(k, shape, dtype=jnp.float32):
        return (0.02 * jax.random.normal(k, shape)).astype(dtype)

    keys = jax.random.split(key, 3 + L)
    params = {
        "tok_emb": nrm(keys[0], (V, H)),
        "pos_emb": nrm(keys[1], (P, H)),
        "typ_emb": nrm(keys[2], (T, H)),
        "ln_g": jnp.ones((1, H), jnp.float32),
        "ln_b": jnp.zeros((1, H), jnp.float32),
        "layers": [],
    }
    for l in range(L):
        lk = jax.random.split(keys[3 + l], 6)
        wqkv = jnp.concatenate(
            [nrm(lk[0], (H, H)), nrm(lk[1], (H, H)), nrm(lk[2], (H, H))],
            axis=1).astype(jnp.bfloat16)                                 # fused QKV, bf16
        params["layers"].append({
            "num_heads": nh,
            "wqkv": wqkv, "bqkv": jnp.zeros((1, 3 * H), jnp.float32),
            "wo": nrm(lk[3], (H, H), jnp.bfloat16), "bo": jnp.zeros((1, H), jnp.float32),
            "ln1_g": jnp.ones((1, H), jnp.float32), "ln1_b": jnp.zeros((1, H), jnp.float32),
            "w1": nrm(lk[4], (H, I), jnp.bfloat16), "b1": jnp.zeros((1, I), jnp.float32),
            "w2": nrm(lk[5], (I, H), jnp.bfloat16), "b2": jnp.zeros((1, H), jnp.float32),
            "ln2_g": jnp.ones((1, H), jnp.float32), "ln2_b": jnp.zeros((1, H), jnp.float32),
        })
    return params


def bert_common_forward(params, input_ids, token_type_ids=None,
                        one_zero_attention_mask=None):
    B, S = input_ids.shape
    if token_type_ids is None:
        token_type_ids = jnp.zeros_like(input_ids)
    if one_zero_attention_mask is None:
        add_mask3 = jnp.zeros((B, 1, S), jnp.float32)
    else:
        add_mask3 = ((1.0 - one_zero_attention_mask.astype(jnp.float32))
                     * -10000.0).reshape(B, 1, S)
    x = embed_forward(params, input_ids, token_type_ids)
    for layer in params["layers"]:
        x = block_forward(layer, x, add_mask3)
    return x


if __name__ == "__main__":
    config = dict(
        vocab_size=64,
        hidden_size=32,
        max_position_embeddings=16,
        type_vocab_size=2,
        num_layers=2,
        num_heads=4,
        intermediate_size=128,
        dropout=0.1,
        layer_norm_epsilon=LN_EPS,
    )
    key = jax.random.PRNGKey(0)
    pkey, ikey = jax.random.split(key)
    params = init_params(pkey, config)

    B, S = 2, 8
    input_ids = jax.random.randint(ikey, (B, S), 0, config["vocab_size"], dtype=jnp.int32)

    out = bert_common_forward(params, input_ids)
    out = jax.block_until_ready(out)
    assert out.shape == (B, S, config["hidden_size"])
    assert bool(jnp.all(jnp.isfinite(out)))
    print("KERNEL_OK")
</pallas_src>

<mosaic_0001>
module attributes {stable_mosaic.version = 11 : i64} {
  func.func @_embed_kernel(%arg0: i32, %arg1: i32, %arg2: memref<2x8xi32, #tpu.memory_space<smem>>, %arg3: memref<2x8xi32, #tpu.memory_space<smem>>, %arg4: memref<1x1x32xf32, #tpu.memory_space<vmem>>, %arg5: memref<1x1x32xf32, #tpu.memory_space<vmem>>, %arg6: memref<1x1x32xf32, #tpu.memory_space<vmem>>, %arg7: memref<1x32xf32, #tpu.memory_space<vmem>>, %arg8: memref<1x32xf32, #tpu.memory_space<vmem>>, %arg9: memref<1x1x1x32xf32, #tpu.memory_space<vmem>>) attributes {dimension_semantics = [#tpu.dimension_semantics<parallel>, #tpu.dimension_semantics<arbitrary>], iteration_bounds = array<i64: 2, 8>, scalar_prefetch = 2 : i64, scratch_operands = 0 : i64, tpu.core_type = #tpu.core_type<tc>, window_params = [{transform_indices = @transform_0, window_bounds = array<i64: 1, 1, 32>}, {transform_indices = @transform_1, window_bounds = array<i64: 1, 1, 32>}, {transform_indices = @transform_2, window_bounds = array<i64: 1, 1, 32>}, {pipeline_mode = #tpu.pipeline_mode<synchronous>, transform_indices = @transform_3, window_bounds = array<i64: 1, 32>}, {pipeline_mode = #tpu.pipeline_mode<synchronous>, transform_indices = @transform_4, window_bounds = array<i64: 1, 32>}, {transform_indices = @transform_5, window_bounds = array<i64: 1, 1, 1, 32>}]} {
    %c0 = arith.constant 0 : index
    %c0_0 = arith.constant 0 : index
    %c0_1 = arith.constant 0 : index
    %0 = vector.load %arg4[%c0, %c0_0, %c0_1] : memref<1x1x32xf32, #tpu.memory_space<vmem>>, vector<1x1x32xf32>
    %1 = vector.shape_cast %0 : vector<1x1x32xf32> to vector<1x32xf32>
    %c0_2 = arith.constant 0 : index
    %c0_3 = arith.constant 0 : index
    %c0_4 = arith.constant 0 : index
    %2 = vector.load %arg5[%c0_2, %c0_3, %c0_4] : memref<1x1x32xf32, #tpu.memory_space<vmem>>, vector<1x1x32xf32>
    %3 = vector.shape_cast %2 : vector<1x1x32xf32> to vector<1x32xf32>
    %4 = arith.addf %1, %3 : vector<1x32xf32>
    %c0_5 = arith.constant 0 : index
    %c0_6 = arith.constant 0 : index
    %c0_7 = arith.constant 0 : index
    %5 = vector.load %arg6[%c0_5, %c0_6, %c0_7] : memref<1x1x32xf32, #tpu.memory_space<vmem>>, vector<1x1x32xf32>
    %6 = vector.shape_cast %5 : vector<1x1x32xf32> to vector<1x32xf32>
    %7 = arith.addf %4, %6 : vector<1x32xf32>
    %c0_8 = arith.constant 0 : index
    %c0_9 = arith.constant 0 : index
    %8 = vector.load %arg7[%c0_8, %c0_9] : memref<1x32xf32, #tpu.memory_space<vmem>>, vector<1x32xf32>
    %c0_10 = arith.constant 0 : index
    %c0_11 = arith.constant 0 : index
    %9 = vector.load %arg8[%c0_10, %c0_11] : memref<1x32xf32, #tpu.memory_space<vmem>>, vector<1x32xf32>
    %cst = arith.constant dense<0.000000e+00> : vector<1xf32>
    %10 = vector.multi_reduction <add>, %7, %cst [1] : vector<1x32xf32> to vector<1xf32>
    %11 = vector.shape_cast %10 : vector<1xf32> to vector<1x1xf32>
    %cst_12 = arith.constant 3.200000e+01 : f32
    %12 = vector.broadcast %cst_12 : f32 to vector<1x1xf32>
    %13 = arith.divf %11, %12 : vector<1x1xf32>
    %14 = vector.broadcast %13 : vector<1x1xf32> to vector<1x32xf32>
    %15 = arith.subf %7, %14 : vector<1x32xf32>
    %16 = arith.mulf %15, %15 : vector<1x32xf32>
    %cst_13 = arith.constant dense<0.000000e+00> : vector<1xf32>
    %17 = vector.multi_reduction <add>, %16, %cst_13 [1] : vector<1x32xf32> to vector<1xf32>
    %18 = vector.shape_cast %17 : vector<1xf32> to vector<1x1xf32>
    %cst_14 = arith.constant 3.200000e+01 : f32
    %19 = vector.broadcast %cst_14 : f32 to vector<1x1xf32>
    %20 = arith.divf %18, %19 : vector<1x1xf32>
    %21 = vector.broadcast %13 : vector<1x1xf32> to vector<1x32xf32>
    %22 = arith.subf %7, %21 : vector<1x32xf32>
    %cst_15 = arith.constant 9.99999996E-13 : f32
    %23 = vector.broadcast %cst_15 : f32 to vector<1x1xf32>
    %24 = arith.addf %20, %23 : vector<1x1xf32>
    %25 = math.rsqrt %24 : vector<1x1xf32>
    %26 = vector.broadcast %25 : vector<1x1xf32> to vector<1x32xf32>
    %27 = arith.mulf %22, %26 : vector<1x32xf32>
    %28 = arith.mulf %27, %8 : vector<1x32xf32>
    %29 = arith.addf %28, %9 : vector<1x32xf32>
    %c0_16 = arith.constant 0 : index
    %c0_17 = arith.constant 0 : index
    %c0_18 = arith.constant 0 : index
    %c0_19 = arith.constant 0 : index
    %30 = vector.load %arg9[%c0_16, %c0_17, %c0_18, %c0_19] : memref<1x1x1x32xf32, #tpu.memory_space<vmem>>, vector<1x1x1x32xf32>
    %31 = vector.shape_cast %30 : vector<1x1x1x32xf32> to vector<1x32xf32>
    %32 = vector.shape_cast %29 : vector<1x32xf32> to vector<1x1x1x32xf32>
    tpu.vector_store %arg9[%c0_16, %c0_17, %c0_18, %c0_19], %32 {strides = array<i32>} : memref<1x1x1x32xf32, #tpu.memory_space<vmem>>, vector<1x1x1x32xf32>,
    return
  }
  func.func @transform_0(%arg0: i32, %arg1: i32, %arg2: memref<2x8xi32, #tpu.memory_space<smem>>, %arg3: memref<2x8xi32, #tpu.memory_space<smem>>) -> (i32, i32, i32) {
    %0 = arith.index_cast %arg0 : i32 to index
    %1 = arith.index_cast %arg1 : i32 to index
    %2 = memref.load %arg2[%0, %1] : memref<2x8xi32, #tpu.memory_space<smem>>
    %c0_i32 = arith.constant 0 : i32
    %c0_i32_0 = arith.constant 0 : i32
    %c0_i32_1 = arith.constant 0 : i32
    return %2, %c0_i32, %c0_i32_0 : i32, i32, i32
  }
  func.func @transform_1(%arg0: i32, %arg1: i32, %arg2: memref<2x8xi32, #tpu.memory_space<smem>>, %arg3: memref<2x8xi32, #tpu.memory_space<smem>>) -> (i32, i32, i32) {
    %c0_i32 = arith.constant 0 : i32
    %c0_i32_0 = arith.constant 0 : i32
    %c0_i32_1 = arith.constant 0 : i32
    return %arg1, %c0_i32, %c0_i32_0 : i32, i32, i32
  }
  func.func @transform_2(%arg0: i32, %arg1: i32, %arg2: memref<2x8xi32, #tpu.memory_space<smem>>, %arg3: memref<2x8xi32, #tpu.memory_space<smem>>) -> (i32, i32, i32) {
    %0 = arith.index_cast %arg0 : i32 to index
    %1 = arith.index_cast %arg1 : i32 to index
    %2 = memref.load %arg3[%0, %1] : memref<2x8xi32, #tpu.memory_space<smem>>
    %c0_i32 = arith.constant 0 : i32
    %c0_i32_0 = arith.constant 0 : i32
    %c0_i32_1 = arith.constant 0 : i32
    return %2, %c0_i32, %c0_i32_0 : i32, i32, i32
  }
  func.func @transform_3(%arg0: i32, %arg1: i32, %arg2: memref<2x8xi32, #tpu.memory_space<smem>>, %arg3: memref<2x8xi32, #tpu.memory_space<smem>>) -> (i32, i32) {
    %c0_i32 = arith.constant 0 : i32
    %c0_i32_0 = arith.constant 0 : i32
    %c0_i32_1 = arith.constant 0 : i32
    return %c0_i32, %c0_i32_0 : i32, i32
  }
  func.func @transform_4(%arg0: i32, %arg1: i32, %arg2: memref<2x8xi32, #tpu.memory_space<smem>>, %arg3: memref<2x8xi32, #tpu.memory_space<smem>>) -> (i32, i32) {
    %c0_i32 = arith.constant 0 : i32
    %c0_i32_0 = arith.constant 0 : i32
    %c0_i32_1 = arith.constant 0 : i32
    return %c0_i32, %c0_i32_0 : i32, i32
  }
  func.func @transform_5(%arg0: i32, %arg1: i32, %arg2: memref<2x8xi32, #tpu.memory_space<smem>>, %arg3: memref<2x8xi32, #tpu.memory_space<smem>>) -> (i32, i32, i32, i32) {
    %c0_i32 = arith.constant 0 : i32
    %c0_i32_0 = arith.constant 0 : i32
    %c0_i32_1 = arith.constant 0 : i32
    return %arg0, %arg1, %c0_i32, %c0_i32_0 : i32, i32, i32, i32
  }
}

</mosaic_0001>

<bundles_post_ra>
// kernel: tpu_custom_call.1
= control target key start
LH: loop header
LB: loop body
LE: loop exit
PB: predicated region body
PF: predicated region fallthrough
CT: control target
= control target key end

     0   :  { %s737_s30 = smov [#allocation3]   ;;  %s738_s8 = smov [#allocation4]   ;;  %s924_s0 = inlined_call_operand.vmem [shape: s32[2,8], index: 0, kind: input, shape index: {}]   ;;  %s925_s2 = inlined_call_operand.vmem [shape: f32[64,1,32], index: 2, kind: input, shape index: {}]   ;;  %s926_s3 = inlined_call_operand.vmem [shape: f32[8,1,32], index: 3, kind: input, shape index: {}]   ;;  %s927_s4 = inlined_call_operand.vmem [shape: f32[2,1,32], index: 4, kind: input, shape index: {}]   ;;  %s928_s5 = inlined_call_operand.vmem [shape: f32[1,32], index: 5, kind: input, shape index: {}]   ;;  %s929_s6 = inlined_call_operand.vmem [shape: f32[1,32], index: 6, kind: input, shape index: {}]   ;;  %s930_s7 = inlined_call_operand.hbm [shape: f32[2,8,1,32], index: 7, kind: output, shape index: {}]   ;;  %s931_s1 = inlined_call_operand.vmem [shape: s32[2,8], index: 1, kind: input, shape index: {}]  }
   0x1   :  { %s13_s26 = sshll.u32 %s924_s0, 4  ;;  %s18_s29 = sshll.u32 %s931_s1, 4  ;;  %s14_s26 = int_to_ptr.vmem [resolvable:$true] %s13_s26  ;;  %s19_s29 = int_to_ptr.vmem [resolvable:$true] %s18_s29 }
   0x2   :  { %16 = dma.vmem_to_smem %s14_s26, 32, %s737_s30, [#allocation2] }
   0x3   :  { %21 = dma.vmem_to_smem %s19_s29, 32, %s738_s8, [#allocation2] }
   0x4   :  { %699 = dma.done.wait [#allocation2], 64 }
   0x5   :  { %700 = vsyncadd [#allocation2], 4294967232 }
   0x6   :  { %24 = sfence }
   0x7   :  { %25 = vsyncpa [#allocation6], 0 }
   0x8   :  { %27 = vsyncpa [#allocation6 + $0x1], 0  ;;  %s786_s9 = smov 0   ;;  %s788_s10 = smov 0  }
   0x9   :  { %s790_s0 = smov 0   ;;  %s792_s11 = smov 0  }
   0xa   :  { %s794_s1 = smov 0   ;;  %s796_s12 = smov 0  }
   0xb   :  { %s798_s13 = smov 0   ;;  %s800_s14 = smov 0  }
   0xc LB: > { %s523_s15 = sadd.s32 4294967295, %s735_s14   ;;  %s524_s16 = sadd.s32 4294967294, %s735_s14   ;;  %s735_s14 = sphi %s800_s14, %s33_s14   ;;  %s731_s13 = sphi %s798_s13, %s946_s13   ;;  %s727_s12 = sphi %s796_s12, %s945_s12   ;;  %s723_s1 = sphi %s794_s1, %s944_s1   ;;  %s719_s11 = sphi %s792_s11, %s943_s11   ;;  %s715_s0 = sphi %s790_s0, %s942_s0   ;;  %s711_s10 = sphi %s788_s10, %s941_s10   ;;  %s707_s9 = sphi %s786_s9, %s940_s9  }
   0xd   : > { %s42_s17 = sadd.s32 1, %s727_s12  ;;  %s45_s18 = sadd.s32 1, %s731_s13 }
   0xe   : > { %p43_p0 = scmp.ge.s32.totalorder %s42_s17, 8  ;;  %p216_p1 = scmp.ne.s32.totalorder %s715_s0, %s711_s10 }
   0xf   : > { %p217_p2 = scmp.eq.s32.totalorder %s523_s15, 15  ;;  %p222_p5 = scmp.ne.s32.totalorder %s711_s10, %s707_s9 }
  0x10   : > { %s948_s17 = smov (%p43_p0, %s42_s17), 0  ;;  %s950_s18 = smov (!%p43_p0, %s45_s18), %s731_s13 }
  0x11   : > { %934 = sst [smem:[#allocation9_spill]] %s948_s17  ;;  %s202_s19 = ssub.s32 %s727_s12, %s948_s17 }
  0x12   : > { %p837_p3 = por %p217_p2, %p216_p1  ;;  %p47_p4 = scmp.ge.s32.totalorder %s950_s18, 2 }
  0x13   : > { %p223_p6 = scmp.eq.s32.totalorder %s524_s16, 15  ;;  %p531_p7 = scmp.ge.s32.totalorder %s735_s14, 1 }
  0x14   : > { %s952_s18 = smov (%p47_p4, %s950_s18), 0  ;;  %p297_p9 = scmp.lt.s32.totalorder %s735_s14, 17 }
  0x15   : > { %936 = sst [smem:[#allocation10_spill]] %s952_s18  ;;  %p846_p8 = por %p223_p6, %p222_p5 }
  0x16   : > { %s201_s22 = ssub.s32 %s731_s13, %s952_s18  ;;  %s206_s23 = sadd.s32 1, %s715_s0 }
  0x17   : > { %s203_s24 = sor.u32 %s202_s19, %s201_s22  ;;  %p298_p10 = pnand %p531_p7, %p297_p9 }
  0x18   : > { %p204_p11 = scmp.eq.s32.totalorder %s203_s24, 0  ;;  %s344_s26 = sshra.s32 (!%p298_p10), %s719_s11, 7 }
  0x19   : > { %301 = sbr.rel (%p298_p10) target bundleno = 316 (0x13c), region = 40  ;;  %s349_s27 = sand.u32 (!%p298_p10), 127, %s719_s11 }
  0x1a   : > { %s855_s25 = scalar_select %p204_p11, %s715_s0, %s206_s23  }
  0x1b   : > { %s346_s28 = sadd.s32 (!%p298_p10), %s723_s1, %s344_s26  ;;  %p363_p12 = scmp.lt.s32.totalorder (!%p298_p10), %s719_s11, 7 }
  0x1c   : > { %s532_s29 = sshll.u32 (!%p298_p10), %s346_s28, 7  ;;  %s342_s18 = sand.u32 (!%p298_p10), 1, %s711_s10  }
  0x1d   : > { %s350_s30 = sadd.s32 (!%p298_p10), %s532_s29, %s349_s27  ;;  %s426_s26 = scalar_lea.sflag (!%p298_p10), [#allocation6], %s342_s18 }
  0x1e   : > { %s351_s8 = sld [smem:[#allocation3 + %s350_s30]]  ;;  %vm392_vm0 = vcmask 253952   ;;  %v739_v6 = vmov 32.0   ;;  %v390_v28 = vld [vmem:[%s928_s5] sm:$0x1] }
  0x1f   : > { %s364_s15 = scalar_select %p363_p12, %s719_s11, 7  ;;  %611 = vrcp.f32 %v739_v6  ;;  %v391_v30 = vld [vmem:[%s929_s6] sm:$0x1] }
  0x20   : > { %s373_s16 = sld [smem:[#allocation4 + %s350_s30]]  ;;  %s659_s30 = scalar_lea.hbm %s930_s7, 16 }
  0x21   : > { %s365_s23 = scalar_lea.vmem %s926_s3, %s364_s15 }
  0x22   : > { %v386_v0 = vld [vmem:[%s365_s23] sm:$0x1]  ;;  %s343_s23 = scalar_lea.vmem [#allocation5], %s342_s18 }
  0x24   : > { %p352_p13 = scmp.lt.s32.totalorder %s351_s8, 63 }
  0x25   : > { %v612_v7 = vpop.eup %611 }
  0x26   : > { %s954_s8 = smov (!%p352_p13, %s351_s8), 63  ;;  %p374_p0 = scmp.lt.s32.totalorder %s373_s16, 1  ;;  %v397_v8 = vmul.f32 32.0, %v612_v7  ;;  %vm401_vm1 = vweird.f32 %v612_v7 }
  0x27   : > { %s354_s17 = scalar_lea.vmem %s925_s2, %s954_s8 }
  0x28   : > { %s956_s16 = smov (!%p374_p0, %s373_s16), 1  ;;  %v385_v1 = vld [vmem:[%s354_s17] sm:$0x1]  ;;  %v398_v9 = vsub.f32 1.0, %v397_v8  ;;  %s534_s17 = sshll.u32 %s723_s1, 3 }
  0x29   : > { %v387_v2 = vadd.f32 %v386_v0, %v385_v1  ;;  %s376_s28 = scalar_lea.vmem %s927_s4, %s956_s16  ;;  %s435_s29 = sadd.s32 %s719_s11, %s534_s17 }
  0x2a   : > { %v388_v3 = vld [vmem:[%s376_s28] sm:$0x1]  ;;  %v399_v10 = vmul.f32 %v612_v7, %v398_v9  ;;  %s436_s15 = scalar_lea.hbm %s930_s7, %s435_s29  ;;  %s438_s11 = sshll.u32 %s343_s23, 4  ;;  %s439_s11 = int_to_ptr.vmem [resolvable:$true] %s438_s11 }
  0x2b   : > { %v389_v4 = vadd.f32 %v388_v3, %v387_v2  ;;  %s440_s24 = sshll.u32 %s436_s15, 4  ;;  %s441_s24 = int_to_ptr.hbm [resolvable:$true] %s440_s24 }
  0x2c   : > { %v400_v11 = vadd.f32 %v612_v7, %v399_v10  ;;  %s653_s27 = sshra.s32 %s441_s24, 4  ;;  %s654_s27 = int_to_ptr.hbm [resolvable:$true] %s653_s27 }
  0x2d   : > { %v393_v5 = vsel %vm392_vm0, %v389_v4, 0.0  ;;  %s655_s28 = scalar_lea.hbm %s654_s27, 1  ;;  %p660_p5 = scmp.lt.s32.totalorder %s654_s27, %s930_s7 }
  0x2e   : > { %394 = vadd.xlane.f32.xlu0 %v393_v5  ;;  %v402_v12 = vsel %vm401_vm1, %v612_v7, %v400_v11  ;;  %p656_p1 = scmp.ne.s32.totalorder %s654_s27, %s655_s28  ;;  %p661_p6 = scmp.lt.s32.totalorder %s659_s30, %s655_s28 }
  0x30   : > { %p657_p2 = pnand %p656_p1, %p837_p3  ;;  %p662_p7 = por %p661_p6, %p660_p5 }
  0x32   : > { %p658_p4 = pneg %p657_p2 }
  0x34   : > { %p663_p9 = pnand %p662_p7, %p658_p4 }
  0xa1   : > { %v395_v13 = vpop.xlane.xlu0 %394 }
  0xa2   : > { %v403_v14 = vmul.f32 %v402_v12, %v395_v13 }
  0xa4   : > { %v404_v15 = vsub.f32 %v389_v4, %v403_v14 }
  0xa6   : > { %v405_v16 = vmul.f32 %v404_v15, %v404_v15 }
  0xa8   : > { %v406_v17 = vsel %vm392_vm0, %v405_v16, 0.0 }
  0xa9   : > { %407 = vadd.xlane.f32.xlu0 %v406_v17 }
 0x11c   : > { %v408_v18 = vpop.xlane.xlu0 %407 }
 0x11d   : > { %v409_v19 = vmul.f32 %v408_v18, %v402_v12 }
 0x11f   : > { %v410_v20 = vadd.f32 1e-12, %v409_v19 }
 0x121   : > { %613 = vrsqrt.f32 %v410_v20  ;;  %vm417_vm3 = vweird.f32 %v410_v20 }
 0x127   : > { %v614_v21 = vpop.eup %613 }
 0x128   : > { %v412_v22 = vmul.f32 %v614_v21, %v410_v20  ;;  %vm418_vm2 = vweird.f32 %v614_v21 }
 0x129   : > { %vm419_vm4 = vmor %vm417_vm3, %vm418_vm2 }
 0x12a   : > { %v413_v23 = vmul.f32 %v614_v21, %v412_v22 }
 0x12c   : > { %v414_v24 = vmul.f32 0.5, %v413_v23 }
 0x12e   : > { %v415_v25 = vsub.f32 1.5, %v414_v24 }
 0x130   : > { %v416_v26 = vmul.f32 %v614_v21, %v415_v25 }
 0x132   : > { %v420_v27 = vsel %vm419_vm4, %v614_v21, %v416_v26 }
 0x133   : > { %v421_v29 = vmul.f32 %v420_v27, %v404_v15 }
 0x135   : > { %v422_v31 = vmul.f32 %v421_v29, %v390_v28 }
 0x137   : > { %v423_v32 = vadd.f32 %v422_v31, %v391_v30 }
 0x139   : > { %424 = vst.msk [vmem:[%s343_s23] sm:$0x1] %vm392_vm0, %v423_v32 }
 0x13a   : > { %666 = shalt.err (!%p663_p9)
}
 0x13b   : > { %537 = dma.vmem_to_hbm [thread:$0]  (%p837_p3), %s439_s11, 16, %s441_s24, %s426_s26  }
 0x13c PF: > { %p543_p10 = scmp.ge.s32.totalorder %s735_s14, 2  ;;  %s452_s18 = sand.u32 1, %s707_s9  }
 0x13d   : > { %s453_s16 = scalar_lea.sflag [#allocation6], %s452_s18 }
 0x13e   : > { %p540_p11 = pnand %p543_p10, %p846_p8 }
 0x140   : > { %p541_p12 = pneg %p540_p11 }
 0x142   : > { %702 = dma.done.wait (%p541_p12), %s453_s16, 16  }
 0x143   : > { %704 = vsyncadd (%p541_p12), %s453_s16, 4294967280  ;;  %s33_s14 = sadd.s32 1, %s735_s14   ;;  %s938_s20 = sld [smem:[#allocation9_spill]] }
 0x144   : > { %p30_p13 = scmp.ge.s32.totalorder %s33_s14, 18   ;;  %s939_s19 = sld [smem:[#allocation10_spill]] }
 0x145   : > { %s940_s9 = smov %s711_s10  ;;  %s941_s10 = smov %s715_s0 }
 0x146   : > { %s942_s0 = smov %s855_s25  ;;  %s943_s11 = smov %s727_s12 }
 0x147   : > { %s944_s1 = smov %s731_s13  ;;  %32 = sbr.rel (!%p30_p13) target bundleno = 12 (0xc), region = 81 }
 0x149   : > { %s945_s12 = smov %s938_s20 }
 0x14a   : > { %s946_s13 = smov %s939_s19 }
 0x14c   :  { %458 = vsyncpa [#allocation6], 1 }
 0x14d   :  { %460 = vsyncpa [#allocation6 + $0x1], 1 }

</bundles_post_ra>
